<compile_context>
chip_gen: v6e
topology: v6e:2x2x1
jax: 0.10.0
libtpu: 0.0.40
codegen_flags: <defaults>
</compile_context>

<pallas_src>
import jax
import jax.numpy as jnp
import numpy as np
from jax.experimental import pallas as pl
from jax.experimental.pallas import tpu as pltpu


def _pick_block(dim, target, quantum):
    """Largest divisor of `dim` that is a multiple of `quantum` and <= target.

    Falls back to the full dim (a full-extent block is always legal)."""
    if dim <= target:
        return dim
    t = (target // quantum) * quantum
    while t >= quantum:
        if dim % t == 0:
            return t
        t -= quantum
    return dim


def _stats_kernel(x_ref, sum_ref, sq_ref):
    """Accumulate per-row sum and sum-of-squares across the lane grid axis."""

    @pl.when(pl.program_id(1) == 0)
    def _init():
        sum_ref[...] = jnp.zeros_like(sum_ref)
        sq_ref[...] = jnp.zeros_like(sq_ref)

    x = x_ref[...].astype(jnp.float32)
    sum_ref[...] += jnp.sum(x, axis=1, keepdims=True)
    sq_ref[...] += jnp.sum(x * x, axis=1, keepdims=True)


def _affine_kernel(x_ref, scale_ref, loc_ref, y_ref):
    """y = scale * (x + loc); scale / loc are per-row (sublane) columns."""
    x = x_ref[...].astype(jnp.float32)
    y_ref[...] = (scale_ref[...] * (x + loc_ref[...])).astype(y_ref.dtype)


def actnorm_forward(x, *, max_block_rows=256, max_block_lanes=2048):
    """ActNorm forward (logdet=True), matching the first call on a fresh module.

    x: (N, C, H, W) float32 (PyTorch NCHW convention).
    Returns (y, logdet) with y of shape (N, C, H, W) and logdet a scalar.
    """
    n, c, h, w = x.shape
    r = n * c            # rows: (n, c) pairs, c fastest (row = n*C + c)
    m = h * w            # lanes per row
    per_ch = n * h * w   # reduction size per channel

    # Free view, no data movement: NCHW -> (N*C, H*W).
    x_rows = x.reshape(r, m)

    br = _pick_block(r, max_block_rows, 8)     # sublane-dense (multiple of 8 or full)
    bm = _pick_block(m, max_block_lanes, 128)  # lane-dense   (multiple of 128 or full)
    grid = (r // br, m // bm)
    itemsize = x.dtype.itemsize

    # ---- pass 1: per-row sum / sum-of-squares (single read of x) -----------
    row_sum, row_sq = pl.pallas_call(
        _stats_kernel,
        out_shape=(
            jax.ShapeDtypeStruct((r, 1), jnp.float32),
            jax.ShapeDtypeStruct((r, 1), jnp.float32),
        ),
        grid=grid,
        in_specs=[pl.BlockSpec((br, bm), lambda i, j: (i, j))],
        out_specs=(
            pl.BlockSpec((br, 1), lambda i, j: (i, 0)),
            pl.BlockSpec((br, 1), lambda i, j: (i, 0)),
        ),
        compiler_params=pltpu.CompilerParams(
            dimension_semantics=("parallel", "arbitrary")),
        cost_estimate=pl.CostEstimate(
            flops=3 * r * m, transcendentals=0,
            bytes_accessed=r * m * itemsize + 2 * r * 4),
    )(x_rows)

    # ---- O(C) finalize: negligible scalar glue outside the hot path --------
    # NOTE: var via sum/sumsq can lose precision if |mean| >> spread; we
    # accumulate in f32 and Glow activations are roughly centred, which keeps
    # this within tolerance.  per_ch == 1 divides by zero (matches torch.std
    # returning nan for a single sample).
    ch_sum = row_sum.reshape(n, c).sum(axis=0)             # (C,)
    ch_sq = row_sq.reshape(n, c).sum(axis=0)               # (C,)
    mean = ch_sum / per_ch
    var = (ch_sq - ch_sum * mean) / (per_ch - 1)           # unbiased, like torch.std
    std = jnp.sqrt(jnp.maximum(var, 0.0))
    scale = 1.0 / (std + 1e-6)                             # (C,)
    loc = -mean                                            # (C,)
    logdet = (h * w) * jnp.sum(jnp.log(jnp.abs(scale)))

    # Per-row parameter columns matching the (N*C, H*W) row layout.
    scale_rows = jnp.tile(scale, n).reshape(r, 1)
    loc_rows = jnp.tile(loc, n).reshape(r, 1)

    # ---- pass 2: y = scale * (x + loc)  (1 read + 1 write of x) ------------
    y_rows = pl.pallas_call(
        _affine_kernel,
        out_shape=jax.ShapeDtypeStruct((r, m), x.dtype),
        grid=grid,
        in_specs=[
            pl.BlockSpec((br, bm), lambda i, j: (i, j)),
            pl.BlockSpec((br, 1), lambda i, j: (i, 0)),
            pl.BlockSpec((br, 1), lambda i, j: (i, 0)),
        ],
        out_specs=pl.BlockSpec((br, bm), lambda i, j: (i, j)),
        compiler_params=pltpu.CompilerParams(
            dimension_semantics=("parallel", "parallel")),
        cost_estimate=pl.CostEstimate(
            flops=2 * r * m, transcendentals=0,
            bytes_accessed=2 * r * m * itemsize),
    )(x_rows, scale_rows, loc_rows)

    # Free view back to NCHW.
    return y_rows.reshape(n, c, h, w), logdet


def _actnorm_ref(x):
    """Pure-JAX reference for correctness checking (mirrors the torch code)."""
    n, c, h, w = x.shape
    flat = jnp.transpose(x, (1, 0, 2, 3)).reshape(c, -1)
    mean = flat.mean(axis=1).reshape(1, c, 1, 1)
    std = jnp.std(flat, axis=1, ddof=1).reshape(1, c, 1, 1)
    loc = -mean
    scale = 1.0 / (std + 1e-6)
    y = scale * (x + loc)
    logdet = h * w * jnp.sum(jnp.log(jnp.abs(scale)))
    return y, logdet


if __name__ == "__main__":
    # NOTE: ActNorm's nn.Parameter loc (zeros) / scale (ones) are overwritten
    # by the data-dependent initialize() on the first forward (initialized==0),
    # so no learned parameters are needed for this synthetic forward pass.
    key = jax.random.PRNGKey(0)
    x = jax.random.normal(key, (2, 4, 16, 16), dtype=jnp.float32)  # N, C, H, W

    fwd = jax.jit(actnorm_forward)
    y, logdet = fwd(x)
    y = jax.block_until_ready(y)
    logdet = jax.block_until_ready(logdet)

    y_ref, logdet_ref = _actnorm_ref(x)
    np.testing.assert_allclose(np.asarray(y), np.asarray(y_ref),
                               rtol=1e-5, atol=1e-5)
    # logdet amplifies per-channel f32 rounding in std by H*W; the fused
    # sum/sumsq stats differ from the two-pass reference only by fp
    # reassociation, so allow a correspondingly larger absolute slack.
    np.testing.assert_allclose(np.asarray(logdet), np.asarray(logdet_ref),
                               rtol=1e-4, atol=5e-3)

    print("KERNEL_OK")
</pallas_src>

<mosaic_0001>
module attributes {stable_mosaic.version = 11 : i64} {
  func.func @_stats_kernel(%arg0: i32, %arg1: i32, %arg2: memref<8x256xf32, #tpu.memory_space<vmem>>, %arg3: memref<8x1xf32, #tpu.memory_space<vmem>>, %arg4: memref<8x1xf32, #tpu.memory_space<vmem>>) attributes {dimension_semantics = [#tpu.dimension_semantics<parallel>, #tpu.dimension_semantics<arbitrary>], iteration_bounds = array<i64: 1, 1>, scalar_prefetch = 0 : i64, scratch_operands = 0 : i64, tpu.core_type = #tpu.core_type<tc>, window_params = [{transform_indices = @transform_0, window_bounds = array<i64: 8, 256>}, {transform_indices = @transform_1, window_bounds = array<i64: 8, 1>}, {transform_indices = @transform_2, window_bounds = array<i64: 8, 1>}]} {
    %c0_i32 = arith.constant 0 : i32
    %0 = arith.cmpi eq, %arg1, %c0_i32 : i32
    %1 = arith.extui %0 : i1 to i32
    %c0_i32_0 = arith.constant 0 : i32
    %2 = arith.cmpi ne, %1, %c0_i32_0 : i32
    scf.if %2 {
      %cst_11 = arith.constant 0.000000e+00 : f32
      %15 = vector.broadcast %cst_11 : f32 to vector<8x1xf32>
      %c0_12 = arith.constant 0 : index
      %c0_13 = arith.constant 0 : index
      %16 = vector.load %arg3[%c0_12, %c0_13] : memref<8x1xf32, #tpu.memory_space<vmem>>, vector<8x1xf32>
      tpu.vector_store %arg3[%c0_12, %c0_13], %15 {strides = array<i32>} : memref<8x1xf32, #tpu.memory_space<vmem>>, vector<8x1xf32>,
      %cst_14 = arith.constant 0.000000e+00 : f32
      %17 = vector.broadcast %cst_14 : f32 to vector<8x1xf32>
      %c0_15 = arith.constant 0 : index
      %c0_16 = arith.constant 0 : index
      %18 = vector.load %arg4[%c0_15, %c0_16] : memref<8x1xf32, #tpu.memory_space<vmem>>, vector<8x1xf32>
      tpu.vector_store %arg4[%c0_15, %c0_16], %17 {strides = array<i32>} : memref<8x1xf32, #tpu.memory_space<vmem>>, vector<8x1xf32>,
    } else {
    }
    %c0 = arith.constant 0 : index
    %c0_1 = arith.constant 0 : index
    %3 = vector.load %arg2[%c0, %c0_1] : memref<8x256xf32, #tpu.memory_space<vmem>>, vector<8x256xf32>
    %c0_2 = arith.constant 0 : index
    %c0_3 = arith.constant 0 : index
    %4 = vector.load %arg3[%c0_2, %c0_3] : memref<8x1xf32, #tpu.memory_space<vmem>>, vector<8x1xf32>
    %cst = arith.constant dense<0.000000e+00> : vector<8xf32>
    %5 = vector.multi_reduction <add>, %3, %cst [1] : vector<8x256xf32> to vector<8xf32>
    %6 = vector.shape_cast %5 : vector<8xf32> to vector<8x1xf32>
    %7 = arith.addf %4, %6 : vector<8x1xf32>
    %c0_4 = arith.constant 0 : index
    %c0_5 = arith.constant 0 : index
    %8 = vector.load %arg3[%c0_4, %c0_5] : memref<8x1xf32, #tpu.memory_space<vmem>>, vector<8x1xf32>
    tpu.vector_store %arg3[%c0_4, %c0_5], %7 {strides = array<i32>} : memref<8x1xf32, #tpu.memory_space<vmem>>, vector<8x1xf32>,
    %c0_6 = arith.constant 0 : index
    %c0_7 = arith.constant 0 : index
    %9 = vector.load %arg4[%c0_6, %c0_7] : memref<8x1xf32, #tpu.memory_space<vmem>>, vector<8x1xf32>
    %10 = arith.mulf %3, %3 : vector<8x256xf32>
    %cst_8 = arith.constant dense<0.000000e+00> : vector<8xf32>
    %11 = vector.multi_reduction <add>, %10, %cst_8 [1] : vector<8x256xf32> to vector<8xf32>
    %12 = vector.shape_cast %11 : vector<8xf32> to vector<8x1xf32>
    %13 = arith.addf %9, %12 : vector<8x1xf32>
    %c0_9 = arith.constant 0 : index
    %c0_10 = arith.constant 0 : index
    %14 = vector.load %arg4[%c0_9, %c0_10] : memref<8x1xf32, #tpu.memory_space<vmem>>, vector<8x1xf32>
    tpu.vector_store %arg4[%c0_9, %c0_10], %13 {strides = array<i32>} : memref<8x1xf32, #tpu.memory_space<vmem>>, vector<8x1xf32>,
    return
  }
  func.func @transform_0(%arg0: i32, %arg1: i32) -> (i32, i32) {
    %c0_i32 = arith.constant 0 : i32
    return %arg0, %arg1 : i32, i32
  }
  func.func @transform_1(%arg0: i32, %arg1: i32) -> (i32, i32) {
    %c0_i32 = arith.constant 0 : i32
    %c0_i32_0 = arith.constant 0 : i32
    return %arg0, %c0_i32 : i32, i32
  }
  func.func @transform_2(%arg0: i32, %arg1: i32) -> (i32, i32) {
    %c0_i32 = arith.constant 0 : i32
    %c0_i32_0 = arith.constant 0 : i32
    return %arg0, %c0_i32 : i32, i32
  }
}

module attributes {stable_mosaic.version = 11 : i64} {
  func.func @_affine_kernel(%arg0: i32, %arg1: i32, %arg2: memref<8x256xf32, #tpu.memory_space<vmem>>, %arg3: memref<8x1xf32, #tpu.memory_space<vmem>>, %arg4: memref<8x1xf32, #tpu.memory_space<vmem>>, %arg5: memref<8x256xf32, #tpu.memory_space<vmem>>) attributes {dimension_semantics = [#tpu.dimension_semantics<parallel>, #tpu.dimension_semantics<parallel>], iteration_bounds = array<i64: 1, 1>, scalar_prefetch = 0 : i64, scratch_operands = 0 : i64, tpu.core_type = #tpu.core_type<tc>, window_params = [{transform_indices = @transform_0, window_bounds = array<i64: 8, 256>}, {transform_indices = @transform_1, window_bounds = array<i64: 8, 1>}, {transform_indices = @transform_2, window_bounds = array<i64: 8, 1>}, {transform_indices = @transform_3, window_bounds = array<i64: 8, 256>}]} {
    %c0 = arith.constant 0 : index
    %c0_0 = arith.constant 0 : index
    %0 = vector.load %arg2[%c0, %c0_0] : memref<8x256xf32, #tpu.memory_space<vmem>>, vector<8x256xf32>
    %c0_1 = arith.constant 0 : index
    %c0_2 = arith.constant 0 : index
    %1 = vector.load %arg3[%c0_1, %c0_2] : memref<8x1xf32, #tpu.memory_space<vmem>>, vector<8x1xf32>
    %c0_3 = arith.constant 0 : index
    %c0_4 = arith.constant 0 : index
    %2 = vector.load %arg4[%c0_3, %c0_4] : memref<8x1xf32, #tpu.memory_space<vmem>>, vector<8x1xf32>
    %3 = vector.broadcast %2 : vector<8x1xf32> to vector<8x256xf32>
    %4 = arith.addf %0, %3 : vector<8x256xf32>
    %5 = vector.broadcast %1 : vector<8x1xf32> to vector<8x256xf32>
    %6 = arith.mulf %5, %4 : vector<8x256xf32>
    %c0_5 = arith.constant 0 : index
    %c0_6 = arith.constant 0 : index
    %7 = vector.load %arg5[%c0_5, %c0_6] : memref<8x256xf32, #tpu.memory_space<vmem>>, vector<8x256xf32>
    tpu.vector_store %arg5[%c0_5, %c0_6], %6 {strides = array<i32>} : memref<8x256xf32, #tpu.memory_space<vmem>>, vector<8x256xf32>,
    return
  }
  func.func @transform_0(%arg0: i32, %arg1: i32) -> (i32, i32) {
    %c0_i32 = arith.constant 0 : i32
    return %arg0, %arg1 : i32, i32
  }
  func.func @transform_1(%arg0: i32, %arg1: i32) -> (i32, i32) {
    %c0_i32 = arith.constant 0 : i32
    %c0_i32_0 = arith.constant 0 : i32
    return %arg0, %c0_i32 : i32, i32
  }
  func.func @transform_2(%arg0: i32, %arg1: i32) -> (i32, i32) {
    %c0_i32 = arith.constant 0 : i32
    %c0_i32_0 = arith.constant 0 : i32
    return %arg0, %c0_i32 : i32, i32
  }
  func.func @transform_3(%arg0: i32, %arg1: i32) -> (i32, i32) {
    %c0_i32 = arith.constant 0 : i32
    return %arg0, %arg1 : i32, i32
  }
}

</mosaic_0001>

<bundles_post_ra>
// kernel: tile.13
= control target key start
LH: loop header
LB: loop body
LE: loop exit
PB: predicated region body
PF: predicated region fallthrough
CT: control target
= control target key end

     0   :  { %s22_s0 = inlined_call_operand.vmem [shape: f32[4], index: 0, kind: input, shape index: {}]   ;;  %s23_s1 = inlined_call_operand.vmem [shape: f32[2,4], index: 1, kind: output, shape index: {}]  }
   0x1   :  { %v4_v0 = vld [vmem:[%s22_s0] ss:$0 sm:$0xff] }
   0x2   :  { %5 = vst [vmem:[%s23_s1] sm:$0x3] %v4_v0 }

// kernel: tile.1
= control target key start
LH: loop header
LB: loop body
LE: loop exit
PB: predicated region body
PF: predicated region fallthrough
CT: control target
= control target key end

     0   :  { %s35_s8 = smov 125   ;;  %vm8_vm0 = vcmask 7168   ;;  %s36_s11 = smov 126   ;;  %s62_s0 = inlined_call_operand.vmem [shape: f32[2,4], index: 0, kind: input, shape index: {}]   ;;  %s63_s1 = inlined_call_operand.vmem [shape: f32[8,1], index: 1, kind: output, shape index: {}]  }
   0x1   :  { %v5_v0 = vld [vmem:[%s62_s0] sm:$0x3]  ;;  %s34_s0 = smov 127  }
   0x2   :  { %6 = vst [vmem:[#allocation0] sm:$0x3] %v5_v0 }
   0x9   :  { %v10_v1 = vld [vmem:[#allocation0] sm:$0x3]  }
   0xa   :  { %v22_v2 = vld [vmem:[#allocation0] sm:$0x3]   ;;  %11 = vrot.lane.b32.xlu0 %v10_v1, %s34_s0 }
   0xb   :  { %23 = vrot.lane.b32.xlu1 %v22_v2, %s35_s8  ;;  %v7_v3 = vld [vmem:[#allocation0] sm:$0x3]  }
   0xc   :  { %v16_v4 = vld [vmem:[#allocation0] sm:$0x3]   ;;  %9 = vst.msk [vmem:[%s63_s1] ss:$4 sm:$0x3] %vm8_vm0, %v7_v3  }
   0xe   :  { %17 = vrot.lane.b32.xlu0 %v16_v4, %s36_s11 }
  0x7c   :  { %v12_v5 = vpop.permute.xlu0 %11  }
  0x7d   :  { %v24_v6 = vpop.permute.xlu1 %23   ;;  %28 = vst.msk [vmem:[%s63_s1 + $0x1] ss:$4 sm:$0x3] %vm8_vm0, %v12_v5  }
  0x7e   :  { %30 = vst.msk [vmem:[%s63_s1 + $0x3] ss:$4 sm:$0x3] %vm8_vm0, %v24_v6  }
  0x80   :  { %v18_v7 = vpop.permute.xlu0 %17  }
  0x81   :  { %29 = vst.msk [vmem:[%s63_s1 + $0x2] ss:$4 sm:$0x3] %vm8_vm0, %v18_v7  }

// kernel: actnorm_forward.2
= control target key start
LH: loop header
LB: loop body
LE: loop exit
PB: predicated region body
PF: predicated region fallthrough
CT: control target
= control target key end

     0   :  { %vm14_vm0 = vcmask 7168   ;;  %v43_v2 = vmov 0.0   ;;  %s87_s0 = inlined_call_operand.vmem [shape: f32[8,256], index: 0, kind: input, shape index: {}]   ;;  %s88_s1 = inlined_call_operand.vmem [shape: f32[8,1], index: 1, kind: output, shape index: {0}]   ;;  %s89_s2 = inlined_call_operand.vmem [shape: f32[8,1], index: 2, kind: output, shape index: {1}]  }
   0x1   :  { %v17_v0 = vld [vmem:[%s87_s0] sm:$0xff]  ;;  %v18_v1 = vld [vmem:[%s87_s0 + $0x8] sm:$0xff]  ;;  %15 = vst.msk [vmem:[%s88_s1] sm:$0xff] %vm14_vm0, %v43_v2  ;;  %16 = vst.msk [vmem:[%s89_s2] sm:$0xff] %vm14_vm0, %v43_v2 }
   0x2   :  { %v20_v3 = vadd.f32 %v18_v1, %v17_v0  ;;  %v27_v4 = vmul.f32 %v17_v0, %v17_v0  ;;  %v28_v5 = vmul.f32 %v18_v1, %v18_v1 }
   0x4   :  { %21 = vadd.xlane.f32.xlu0 %v20_v3  ;;  %v29_v6 = vadd.f32 %v28_v5, %v27_v4 }
   0x8   :  { %30 = vadd.xlane.f32.xlu0 %v29_v6  ;;  %v19_v7 = vld [vmem:[%s88_s1] sm:$0xff] }
   0x9   :  { %v26_v10 = vld [vmem:[%s89_s2] sm:$0xff] }
  0x8d   :  { %v22_v8 = vpop.xlane.xlu0 %21 }
  0x8e   :  { %v23_v9 = vadd.f32 %v22_v8, %v19_v7 }
  0x90   :  { %25 = vst.msk [vmem:[%s88_s1] sm:$0xff] %vm14_vm0, %v23_v9 }
  0x91   :  { %v31_v11 = vpop.xlane.xlu0 %30 }
  0x92   :  { %v32_v12 = vadd.f32 %v31_v11, %v26_v10 }
  0x94   :  { %33 = vst.msk [vmem:[%s89_s2] sm:$0xff] %vm14_vm0, %v32_v12 }

// kernel: actnorm_forward.3
= control target key start
LH: loop header
LB: loop body
LE: loop exit
PB: predicated region body
PF: predicated region fallthrough
CT: control target
= control target key end

     0   :  { %v40_v0 = vmov 0   ;;  %s79_s2 = inlined_call_operand.vmem [shape: f32[8,1], index: 2, kind: input, shape index: {}]   ;;  %s80_s1 = inlined_call_operand.vmem [shape: f32[8,1], index: 1, kind: input, shape index: {}]   ;;  %s81_s0 = inlined_call_operand.vmem [shape: f32[8,256], index: 0, kind: input, shape index: {}]   ;;  %s82_s3 = inlined_call_operand.vmem [shape: f32[8,256], index: 3, kind: output, shape index: {}]  }
   0x1   :  { %39 = vset.pattern.permute.xlu0 %v40_v0  ;;  %v17_v1 = vld [vmem:[%s79_s2] sm:$0xff]  ;;  %v15_v5 = vld [vmem:[%s81_s0 + $0x8] sm:$0xff] }
   0x2   :  { %20 = vperm.xlu0 %39, %v17_v1   ;;  %v16_v2 = vld [vmem:[%s80_s1] sm:$0xff] }
   0x3   :  { %v14_v4 = vld [vmem:[%s81_s0] sm:$0xff] }
   0x6   :  { %27 = vperm.xlu0 %39, %v16_v2  }
  0x7d   :  { %v21_v3 = vpop.permute.xlu0 %20 }
  0x7e   :  { %v23_v6 = vadd.f32 %v21_v3, %v14_v4  ;;  %v24_v7 = vadd.f32 %v21_v3, %v15_v5 }
  0x81   :  { %v28_v8 = vpop.permute.xlu0 %27 }
  0x82   :  { %v30_v9 = vmul.f32 %v28_v8, %v23_v6  ;;  %v31_v10 = vmul.f32 %v28_v8, %v24_v7 }
  0x84   :  { %32 = vst [vmem:[%s82_s3] sm:$0xff] %v30_v9  ;;  %33 = vst [vmem:[%s82_s3 + $0x8] sm:$0xff] %v31_v10 }

</bundles_post_ra>
